<compile_context>
chip_gen: v7x
topology: tpu7x:2x2x1
jax: 0.10.0
libtpu: 0.0.40
codegen_flags: <defaults>
</compile_context>

<pallas_src>
import jax
import jax.numpy as jnp
from jax.experimental import pallas as pl
from jax.experimental.pallas import tpu as pltpu


# ----------------------------------------------------------------------------
# Small helpers
# ----------------------------------------------------------------------------
def _round_up(n, m):
    return ((n + m - 1) // m) * m


def _bytes(shape, dtype):
    n = 1
    for s in shape:
        n *= int(s)
    return n * jnp.dtype(dtype).itemsize


def _total_bytes(terms):
    """terms: iterable of (num_buffers, shape, dtype)."""
    return sum(nbuf * _bytes(shape, dt) for nbuf, shape, dt in terms)


def _vmem_limit(total_bytes):
    """Scoped-VMEM limit: footprint + 25% headroom, clamped to [4, 64] MiB."""
    total = int(total_bytes * 1.25) + (1 << 20)
    return min(max(total, 4 << 20), 64 << 20)


def _choose_batch_tile(batch, block_batch, min_tiles=2):
    """8-aligned batch tile, balanced across tiles, >= min_tiles when possible
    (so the "parallel" batch axis spans both TensorCores on v7x)."""
    tm_target = _round_up(max(1, min(block_batch, batch)), 8)
    nb = pl.cdiv(batch, tm_target)
    if nb < min_tiles:
        nb = min(min_tiles, pl.cdiv(batch, 8))
    nb = max(nb, 1)
    tm = _round_up(pl.cdiv(batch, nb), 8)
    return tm, _round_up(batch, tm)


# ----------------------------------------------------------------------------
# Kernels
# ----------------------------------------------------------------------------
def _fused_linear_kernel(x_ref, w_ref, b_ref, o_ref):
    # One lane-dense MXU matmul (f32 accumulate) + broadcast bias add.
    acc = jnp.dot(x_ref[...], w_ref[...], preferred_element_type=jnp.float32)
    o_ref[...] = (acc + b_ref[...]).astype(o_ref.dtype)


def _two_linear_kernel(x_ref, wh_ref, bh_ref, wo_ref, bo_ref, o_ref, h_ref):
    # Hidden activation computed once per batch tile (j == 0) and kept in a
    # VMEM scratch across all output-column tiles j.
    @pl.when(pl.program_id(1) == 0)
    def _():
        h = jnp.dot(x_ref[...], wh_ref[...], preferred_element_type=jnp.float32)
        h_ref[...] = h + bh_ref[...]

    h = h_ref[...].astype(wo_ref.dtype)
    acc = jnp.dot(h, wo_ref[...], preferred_element_type=jnp.float32)
    o_ref[...] = (acc + bo_ref[...]).astype(o_ref.dtype)


# ----------------------------------------------------------------------------
# One-time parameter preparation
# ----------------------------------------------------------------------------
def prepare_params(w_hidden, b_hidden, w_output, b_output,
                   compute_dtype=jnp.float32, out_block=512):
    """One-time prep (call at load time, not per forward).

    Takes PyTorch-convention (out_features, in_features) weights.  Decides
    whether fusing the two linears pays off, pads everything lane-dense and
    casts weights to compute_dtype (bf16 is MXU-native on v5e/v6e/v7x; biases
    stay f32 -- they are added after the f32 accumulate).
    """
    in_size = int(w_hidden.shape[1])
    hidden_size = int(w_hidden.shape[0])
    out_size = int(w_output.shape[0])

    in_p = _round_up(in_size, 128)
    hid_p = _round_up(hidden_size, 128)

    # Output column tile tn (<= out_block); pad Out to a multiple of it so the
    # (i, j) grid divides evenly.
    out_p0 = _round_up(out_size, 128)
    n_j = pl.cdiv(out_p0, max(128, _round_up(out_block, 128)))
    tn = _round_up(pl.cdiv(out_p0, n_j), 128)
    out_p = n_j * tn

    # Fused path does 2*In*Out FLOPs (and weight bytes) per row; unfused does
    # 2*H*(In+Out).  Only fuse when it is actually cheaper.
    fuse = in_size * out_size <= hidden_size * (in_size + out_size)

    f32 = jnp.float32
    if fuse:
        w_f = w_hidden.T.astype(f32) @ w_output.T.astype(f32)          # (In, Out)
        b_f = b_hidden.astype(f32) @ w_output.T.astype(f32) + b_output.astype(f32)
        w_pad = jnp.zeros((in_p, out_p), f32).at[:in_size, :out_size].set(w_f)
        b_pad = jnp.zeros((1, out_p), f32).at[0, :out_size].set(b_f)
        return dict(fused=True, in_size=in_size, out_size=out_size,
                    in_p=in_p, out_p=out_p, tn=tn,
                    w=w_pad.astype(compute_dtype), b=b_pad)

    wh = jnp.zeros((in_p, hid_p), f32).at[:in_size, :hidden_size].set(
        w_hidden.T.astype(f32))
    bh = jnp.zeros((1, hid_p), f32).at[0, :hidden_size].set(b_hidden.astype(f32))
    wo = jnp.zeros((hid_p, out_p), f32).at[:hidden_size, :out_size].set(
        w_output.T.astype(f32))
    bo = jnp.zeros((1, out_p), f32).at[0, :out_size].set(b_output.astype(f32))
    return dict(fused=False, in_size=in_size, out_size=out_size,
                in_p=in_p, out_p=out_p, tn=tn, hid_p=hid_p,
                wh=wh.astype(compute_dtype), bh=bh,
                wo=wo.astype(compute_dtype), bo=bo)


# ----------------------------------------------------------------------------
# Forward pass
# ----------------------------------------------------------------------------
def embedding_cbow_forward(x, params, *, block_batch=512, out_dtype=jnp.float32):
    """y = hidden -> output linear chain, tiled over (batch, out-columns)."""
    B = int(x.shape[0])
    in_size, out_size = params["in_size"], params["out_size"]
    in_p, out_p, tn = params["in_p"], params["out_p"], params["tn"]
    fused = params["fused"]
    cdt = params["w"].dtype if fused else params["wh"].dtype

    tm, b_p = _choose_batch_tile(B, block_batch)

    def footprint(tm_):
        if fused:
            return [(2, (tm_, in_p), cdt), (2, (in_p, tn), cdt),
                    (2, (1, tn), jnp.float32), (2, (tm_, tn), out_dtype)]
        hid_p = params["hid_p"]
        return [(2, (tm_, in_p), cdt),
                (1, (in_p, hid_p), cdt), (1, (1, hid_p), jnp.float32),
                (2, (hid_p, tn), cdt), (2, (1, tn), jnp.float32),
                (2, (tm_, tn), out_dtype),
                (1, (tm_, hid_p), jnp.float32)]

    # Shrink batch tile if the per-step footprint would overshoot the budget.
    budget = 48 << 20
    while tm > 8 and _total_bytes(footprint(tm)) > budget:
        tm = _round_up(tm // 2, 8)
    b_p = _round_up(B, tm)

    n_b = b_p // tm
    n_j = out_p // tn
    single_j = n_j == 1
    vmem_limit = _vmem_limit(_total_bytes(footprint(tm)))

    # Skip the pad copy entirely when x is already tile-aligned.
    if B == b_p and in_size == in_p and x.dtype == cdt:
        x_pad = x
    elif B == b_p and in_size == in_p:
        x_pad = x.astype(cdt)
    else:
        x_pad = jnp.zeros((b_p, in_p), cdt).at[:B, :in_size].set(x.astype(cdt))

    def resident(shape, index_map, always_single=False):
        # Single-buffer specs whose block index never changes across the grid.
        if always_single or single_j:
            return pl.BlockSpec(shape, index_map, pipeline_mode=pl.Buffered(1))
        return pl.BlockSpec(shape, index_map)

    x_spec = pl.BlockSpec((tm, in_p), lambda i, j: (i, 0))
    out_spec = pl.BlockSpec((tm, tn), lambda i, j: (i, j))

    if fused:
        out = pl.pallas_call(
            _fused_linear_kernel,
            out_shape=jax.ShapeDtypeStruct((b_p, out_p), out_dtype),
            grid_spec=pltpu.PrefetchScalarGridSpec(
                num_scalar_prefetch=0,
                grid=(n_b, n_j),
                in_specs=[
                    x_spec,                                      # x tile
                    resident((in_p, tn), lambda i, j: (0, j)),   # fused W
                    resident((1, tn), lambda i, j: (0, j)),      # fused bias
                ],
                out_specs=out_spec,
            ),
            compiler_params=pltpu.CompilerParams(
                dimension_semantics=("parallel", "parallel"),
                vmem_limit_bytes=vmem_limit),
        )(x_pad, params["w"], params["b"])
    else:
        hid_p = params["hid_p"]
        out = pl.pallas_call(
            _two_linear_kernel,
            out_shape=jax.ShapeDtypeStruct((b_p, out_p), out_dtype),
            grid_spec=pltpu.PrefetchScalarGridSpec(
                num_scalar_prefetch=0,
                grid=(n_b, n_j),
                in_specs=[
                    x_spec,                                                     # x tile
                    resident((in_p, hid_p), lambda i, j: (0, 0), True),         # Wh (resident)
                    resident((1, hid_p), lambda i, j: (0, 0), True),            # bh (resident)
                    resident((hid_p, tn), lambda i, j: (0, j)),                 # Wo column tile
                    resident((1, tn), lambda i, j: (0, j)),                     # bo column tile
                ],
                out_specs=out_spec,
                scratch_shapes=[pltpu.VMEM((tm, hid_p), jnp.float32)],          # hidden act
            ),
            compiler_params=pltpu.CompilerParams(
                # j carries the (tm, H) hidden scratch -> must stay "arbitrary".
                dimension_semantics=("parallel", "arbitrary"),
                vmem_limit_bytes=vmem_limit),
        )(x_pad, params["wh"], params["bh"], params["wo"], params["bo"])

    if B == b_p and out_size == out_p:
        return out
    return out[:B, :out_size]


# ----------------------------------------------------------------------------
# Demo / self-test
# ----------------------------------------------------------------------------
def _init_linear(key, in_features, out_features):
    """Mirror nn.Linear default init U(-1/sqrt(in), 1/sqrt(in))."""
    kw, kb = jax.random.split(key)
    bound = float(1.0 / jnp.sqrt(jnp.float32(in_features)))
    w = jax.random.uniform(kw, (out_features, in_features), jnp.float32,
                           minval=-bound, maxval=bound)
    b = jax.random.uniform(kb, (out_features,), jnp.float32,
                           minval=-bound, maxval=bound)
    return w, b


def _reference(x, w_h, b_h, w_o, b_o):
    return (x @ w_h.T + b_h) @ w_o.T + b_o


if __name__ == "__main__":
    root = jax.random.PRNGKey(0)
    key_a, key_b = jax.random.split(root, 2)

    # --- Config A: small head where fusion pays off (In*Out <= H*(In+Out)).
    batch, in_sz, hid_sz, out_sz = 16, 32, 64, 32
    k_x, k_h, k_o = jax.random.split(key_a, 3)
    x = jax.random.normal(k_x, (batch, in_sz), jnp.float32)
    w_h, b_h = _init_linear(k_h, in_sz, hid_sz)
    w_o, b_o = _init_linear(k_o, hid_sz, out_sz)
    ref = _reference(x, w_h, b_h, w_o, b_o)

    params = prepare_params(w_h, b_h, w_o, b_o, compute_dtype=jnp.float32)
    assert params["fused"], "expected fused path for this shape"
    y = embedding_cbow_forward(x, params, block_batch=8)   # 2 batch tiles
    y = jax.block_until_ready(y)
    assert y.shape == (batch, out_sz)
    assert jnp.allclose(y, ref, atol=1e-3, rtol=1e-3)

    # bf16 compute + bf16 output (MXU-native on v5e/v6e/v7x, f32 accumulate).
    params16 = prepare_params(w_h, b_h, w_o, b_o, compute_dtype=jnp.bfloat16)
    y16 = embedding_cbow_forward(x, params16, out_dtype=jnp.bfloat16)
    y16 = jax.block_until_ready(y16)
    assert jnp.allclose(y16.astype(jnp.float32), ref, atol=5e-2, rtol=5e-2)

    # --- Config B: vocab-like shape (In, Out >> H) where fusion would be a
    # perf cliff; exercises the two-matmul kernel with the (tm, H) VMEM
    # scratch and an output-column-tiled grid (out_block=128 -> 3 col tiles).
    batch_b, in_b, hid_b, out_b = 24, 256, 32, 384
    k_x2, k_h2, k_o2 = jax.random.split(key_b, 3)
    x2 = jax.random.normal(k_x2, (batch_b, in_b), jnp.float32)
    w_h2, b_h2 = _init_linear(k_h2, in_b, hid_b)
    w_o2, b_o2 = _init_linear(k_o2, hid_b, out_b)
    ref2 = _reference(x2, w_h2, b_h2, w_o2, b_o2)

    params2 = prepare_params(w_h2, b_h2, w_o2, b_o2,
                             compute_dtype=jnp.float32, out_block=128)
    assert not params2["fused"], "expected two-matmul path for this shape"
    y2 = embedding_cbow_forward(x2, params2)
    y2 = jax.block_until_ready(y2)
    assert y2.shape == (batch_b, out_b)
    assert jnp.allclose(y2, ref2, atol=2e-3, rtol=2e-3)

    # TODO(synk): get_embedding(x) = output.weight[list(x).index(1)] is a
    # host-side row lookup; it stays plain array indexing outside Pallas.
    print("KERNEL_OK")
</pallas_src>

<mosaic_0001>
module attributes {stable_mosaic.version = 11 : i64} {
  func.func @_fused_linear_kernel(%arg0: i32, %arg1: i32, %arg2: memref<8x128xf32, #tpu.memory_space<vmem>>, %arg3: memref<128x128xf32, #tpu.memory_space<vmem>>, %arg4: memref<1x128xf32, #tpu.memory_space<vmem>>, %arg5: memref<8x128xf32, #tpu.memory_space<vmem>>) attributes {dimension_semantics = [#tpu.dimension_semantics<parallel>, #tpu.dimension_semantics<parallel>], iteration_bounds = array<i64: 2, 1>, scalar_prefetch = 0 : i64, scratch_operands = 0 : i64, tpu.core_type = #tpu.core_type<tc>, window_params = [{transform_indices = @transform_0, window_bounds = array<i64: 8, 128>}, {pipeline_mode = #tpu.pipeline_mode<synchronous>, transform_indices = @transform_1, window_bounds = array<i64: 128, 128>}, {pipeline_mode = #tpu.pipeline_mode<synchronous>, transform_indices = @transform_2, window_bounds = array<i64: 1, 128>}, {transform_indices = @transform_3, window_bounds = array<i64: 8, 128>}]} {
    %c0 = arith.constant 0 : index
    %c0_0 = arith.constant 0 : index
    %0 = vector.load %arg2[%c0, %c0_0] : memref<8x128xf32, #tpu.memory_space<vmem>>, vector<8x128xf32>
    %c0_1 = arith.constant 0 : index
    %c0_2 = arith.constant 0 : index
    %1 = vector.load %arg3[%c0_1, %c0_2] : memref<128x128xf32, #tpu.memory_space<vmem>>, vector<128x128xf32>
    %cst = arith.constant dense<0.000000e+00> : vector<8x128xf32>
    %2 = tpu.matmul %0, %1, %cst {dimension_numbers = #tpu.dot_dimension_numbers<[1], [0], [0], [1], [0, 0, 1, 1], [], []>} : vector<8x128xf32>, vector<128x128xf32>, vector<8x128xf32> -> vector<8x128xf32>
    %c0_3 = arith.constant 0 : index
    %c0_4 = arith.constant 0 : index
    %3 = vector.load %arg4[%c0_3, %c0_4] : memref<1x128xf32, #tpu.memory_space<vmem>>, vector<1x128xf32>
    %4 = vector.broadcast %3 : vector<1x128xf32> to vector<8x128xf32>
    %5 = arith.addf %2, %4 : vector<8x128xf32>
    %c0_5 = arith.constant 0 : index
    %c0_6 = arith.constant 0 : index
    %6 = vector.load %arg5[%c0_5, %c0_6] : memref<8x128xf32, #tpu.memory_space<vmem>>, vector<8x128xf32>
    tpu.vector_store %arg5[%c0_5, %c0_6], %5 {strides = array<i32>} : memref<8x128xf32, #tpu.memory_space<vmem>>, vector<8x128xf32>,
    return
  }
  func.func @transform_0(%arg0: i32, %arg1: i32) -> (i32, i32) {
    %c0_i32 = arith.constant 0 : i32
    %c0_i32_0 = arith.constant 0 : i32
    return %arg0, %c0_i32 : i32, i32
  }
  func.func @transform_1(%arg0: i32, %arg1: i32) -> (i32, i32) {
    %c0_i32 = arith.constant 0 : i32
    %c0_i32_0 = arith.constant 0 : i32
    return %c0_i32, %arg1 : i32, i32
  }
  func.func @transform_2(%arg0: i32, %arg1: i32) -> (i32, i32) {
    %c0_i32 = arith.constant 0 : i32
    %c0_i32_0 = arith.constant 0 : i32
    return %c0_i32, %arg1 : i32, i32
  }
  func.func @transform_3(%arg0: i32, %arg1: i32) -> (i32, i32) {
    %c0_i32 = arith.constant 0 : i32
    return %arg0, %arg1 : i32, i32
  }
}

</mosaic_0001>

<bundles_post_ra>
// kernel: tpu_custom_call.1
= control target key start
LH: loop header
LB: loop body
LE: loop exit
PB: predicated region body
PF: predicated region fallthrough
CT: control target
= control target key end

     0   :  { %8 = vsyncpa [#allocation3], 0  ;;  %s1018_s0 = inlined_call_operand.hbm [shape: f32[16,128], index: 0, kind: input, shape index: {}]   ;;  %s1019_s1 = inlined_call_operand.hbm [shape: f32[128,128], index: 1, kind: input, shape index: {}]   ;;  %s1020_s2 = inlined_call_operand.vmem [shape: f32[1,128], index: 2, kind: input, shape index: {}]   ;;  %s1021_s3 = inlined_call_operand.hbm [shape: f32[16,128], index: 3, kind: output, shape index: {}]  }
   0x1   :  { %10 = vsyncpa [#allocation3 + $0x1], 0 }
   0x2   :  { %11 = vsyncpa [#allocation6], 0 }
   0x3   :  { %12 = vsyncpa [#allocation4], 0 }
   0x4   :  { %14 = vsyncpa [#allocation4 + $0x1], 0  ;;  %s794_s12 = smov 0   ;;  %s796_s13 = smov 0  }
   0x5   :  { %s798_s14 = smov 0   ;;  %s800_s15 = smov 0  }
   0x6   :  { %s802_s16 = smov 0   ;;  %s804_s17 = smov 0  }
   0x7 LB: > { %s449_s18 = sadd.s32 4294967295, %s764_s17   ;;  %s450_s19 = sadd.s32 4294967294, %s764_s17   ;;  %s764_s17 = sphi %s804_s17, %s20_s17   ;;  %s760_s16 = sphi %s802_s16, %s1045_s16   ;;  %s756_s15 = sphi %s800_s15, %s1044_s15   ;;  %s752_s14 = sphi %s798_s14, %s1043_s14   ;;  %s748_s13 = sphi %s796_s13, %s1042_s13   ;;  %s744_s12 = sphi %s794_s12, %s1041_s12  }
   0x8   : > { %p52_p0 = scmp.ne.s32.totalorder %s748_s13, %s744_s12  ;;  %p828_p1 = scmp.eq.s32.totalorder %s449_s18, 0 }
   0x9   : > { %p832_p2 = scmp.eq.s32.totalorder %s449_s18, 1  ;;  %p136_p3 = scmp.eq.s32.totalorder %s450_s19, 1 }
   0xa   : > { %s1026_s20 = scalar_select %p828_p1, 1, 0 }
   0xb   : > { %s1027_s21 = scalar_select %p832_p2, 1, 0 }
   0xc   : > { %p838_p4 = por %p828_p1, %p52_p0  ;;  %p451_p5 = scmp.ge.s32.totalorder %s764_s17, 1 }
   0xd   : > { %p843_p6 = por %p136_p3, %p52_p0  ;;  %p143_p7 = scmp.lt.s32.totalorder %s764_s17, 3 }
   0xe   : > { %s1028_s22 = scalar_select %p838_p4, 1, 0 }
   0xf   : > { %s1029_s23 = scalar_select %p843_p6, 1, 0 }
  0x10   : > { %p848_p8 = pnand %p451_p5, %p143_p7  ;;  %s766_s25 = smov [#allocation5]  }
  0x11   : > { %s157_s26 = sshll.u32 %s766_s25, 4  ;;  %s32_s28 = sadd.s32 1, %s760_s16  ;;  %s158_s26 = int_to_ptr.vmem [resolvable:$true] %s157_s26 }
  0x12   : > { %s1030_s24 = scalar_select %p848_p8, 1, 0 }
  0x13   : > { %p550_p9 = pneg %p848_p8  ;;  %s620_s4 = scalar_lea.hbm %s1019_s1, 2048 }
  0x14   : > { %p621_p12 = scmp.ne.s32.totalorder %s1019_s1, %s620_s4  ;;  %p627_p5 = scmp.lt.u32.totalorder %s620_s4, %s1019_s1 }
  0x15   : > { %p857_p11 = pnand %p550_p9, %p828_p1 }
  0x17   : > { %p622_p13 = pneg %p857_p11 }
  0x19   : > { %p623_p0 = pnand %p622_p13, %p621_p12 }
  0x1b   : > { %p624_p3 = pneg %p623_p0 }
  0x1d   : > { %p629_p7 = pnand %p627_p5, %p624_p3 }
  0x1f   : > { %632 = shalt.err (!%p629_p7)
}
  0x20   : > { %s633_s9 = scalar_lea.vmem %s158_s26, 2048  ;;  %p641_p1 = scmp.lt.s32.totalorder %s158_s26, %s158_s26 }
  0x21   : > { %p634_p9 = scmp.ne.s32.totalorder %s158_s26, %s633_s9  ;;  %p642_p4 = scmp.lt.s32.totalorder %s633_s9, %s633_s9 }
  0x23   : > { %p636_p10 = pnand %p634_p9, %p622_p13  ;;  %p643_p8 = por %p642_p4, %p641_p1 }
  0x25   : > { %p637_p6 = pneg %p636_p10 }
  0x27   : > { %p644_p2 = pnand %p643_p8, %p637_p6 }
  0x29   : > { %647 = shalt.err (!%p644_p2)
}
  0x2a   : > { %s767_s10 = smov 128   ;;  %s768_s11 = smov 8  }
  0x2b   : > { %553 = dma.hbm_to_vmem [thread:$0]  (!%p857_p11), %s1019_s1, 2048, %s158_s26, [#allocation6], %s767_s10, %s767_s10, %s768_s11  }
  0x2c   : > { %p34_p1 = scmp.ge.s32.totalorder %s32_s28, 2  ;;  %s39_s25 = sadd.s32 1, %s752_s14 }
  0x2d   : > { %p46_p2 = scmp.ne.s32.totalorder %s752_s14, %s748_s13  ;;  %p47_p4 = scmp.eq.s32.totalorder %s764_s17, 0 }
  0x2e   : > { %s1047_s28 = smov (%p34_p1, %s32_s28), 0  ;;  %p1033_p8 = scmp.ne.s32.totalorder %s1027_s21, 0 }
  0x2f   : > { %p884_p6 = por %p47_p4, %p46_p2  ;;  %s36_s27 = ssub.s32 %s760_s16, %s1047_s28 }
  0x30   : > { %p890_p10 = por %p1033_p8, %p46_p2  ;;  %p563_p12 = scmp.lt.s32.totalorder %s764_s17, 2 }
  0x31   : > { %p37_p11 = scmp.eq.s32.totalorder %s36_s27, 0  ;;  %s177_s26 = sand.u32 1, %s752_s14  }
  0x32   : > { %s455_s4 = sshll.u32 %s177_s26, 3  ;;  %s456_s6 = sshll.u32 %s760_s16, 7 }
  0x33   : > { %s899_s5 = scalar_select %p37_p11, %s752_s14, %s39_s25  }
  0x34   : > { %s905_s9 = scalar_lea.hbm %s1018_s0, %s456_s6  ;;  %s181_s21 = scalar_lea.vmem [#allocation2], %s455_s4 }
  0x35   : > { %s188_s10 = sshll.u32 %s181_s21, 4  ;;  %p911_p13 = pnand %p563_p12, %p884_p6  ;;  %s907_s10 = int_to_ptr.vmem [resolvable:$true] %s188_s10 }
  0x36   : > { %s178_s18 = scalar_lea.sflag [#allocation3], %s177_s26  ;;  %s648_s19 = scalar_lea.hbm %s905_s9, 128 }
  0x37   : > { %p649_p0 = scmp.ne.s32.totalorder %s905_s9, %s648_s19  ;;  %p650_p3 = pneg %p911_p13 }
  0x38   : > { %s653_s4 = scalar_lea.hbm %s1018_s0, 256  ;;  %p654_p9 = scmp.lt.u32.totalorder %s905_s9, %s1018_s0 }
  0x39   : > { %p651_p5 = pnand %p650_p3, %p649_p0  ;;  %p655_p1 = scmp.lt.u32.totalorder %s653_s4, %s648_s19 }
  0x3a   : > { %p657_p4 = scmp.lt.u32.totalorder %s648_s19, %s905_s9 }
  0x3b   : > { %p652_p7 = pneg %p651_p5  ;;  %p656_p2 = por %p655_p1, %p654_p9 }
  0x3d   : > { %p658_p6 = por %p657_p4, %p656_p2 }
  0x3f   : > { %p659_p8 = pnand %p658_p6, %p652_p7 }
  0x41   : > { %662 = shalt.err (!%p659_p8)
}
  0x42   : > { %s663_s26 = scalar_lea.vmem %s907_s10, 128  ;;  %s769_s7 = smov [#allocation2]  }
  0x43   : > { %p664_p12 = scmp.ne.s32.totalorder %s907_s10, %s663_s26  ;;  %s668_s8 = sshll.u32 %s769_s7, 4  ;;  %s669_s8 = int_to_ptr.vmem [resolvable:$false] %s668_s8 }
  0x44   : > { %s670_s21 = scalar_lea.vmem %s669_s8, 256  ;;  %p671_p5 = scmp.lt.s32.totalorder %s907_s10, %s669_s8 }
  0x45   : > { %p666_p11 = pnand %p664_p12, %p650_p3  ;;  %p672_p9 = scmp.lt.s32.totalorder %s670_s21, %s663_s26 }
  0x47   : > { %p667_p0 = pneg %p666_p11  ;;  %p673_p1 = por %p672_p9, %p671_p5 }
  0x49   : > { %p674_p2 = pnand %p673_p1, %p667_p0 }
  0x4b   : > { %677 = shalt.err (!%p674_p2)
}
  0x4c   : > { %557 = dma.hbm_to_vmem [thread:$0]  (!%p911_p13), %s905_s9, 128, %s907_s10, %s178_s18  }
  0x4d   : > { %p1036_p7 = scmp.ne.s32.totalorder %s1030_s24, 0 }
  0x4e   : > { %s943_s19 = sand.u32 (!%p1036_p7), 1, %s748_s13   ;;  %p1037_p3 = scmp.ne.s32.totalorder (!%p1036_p7), %s1028_s22, 0 }
  0x4f   : > { %197 = sbr.rel (%p1036_p7) target bundleno = 353 (0x161), region = 32  ;;  %s458_s25 = sshll.u32 (!%p1036_p7), %s943_s19, 3 }
  0x50   : > { %s200_s27 = scalar_lea.sflag (!%p1036_p7), [#allocation3], %s943_s19  ;;  %s949_s4 = scalar_lea.vmem (!%p1036_p7), [#allocation2], %s458_s25 }
  0x56   : > { %731 = dma.done.wait (%p1037_p3), %s200_s27, 128  }
  0x57   : > { %733 = vsyncadd (%p1037_p3), %s200_s27, 4294967168  ;;  %p1038_p13 = scmp.ne.s32.totalorder %s1026_s20, 0 }
  0x59   : > { %735 = dma.done.wait (%p1038_p13), [#allocation6], 2048  }
  0x5a   : > { %737 = vsyncadd (%p1038_p13), [#allocation6], 4294965248  ;;  %v770_v0 = vmov 0.0|0.0   ;;  %vm771_vm0 = vmmov 0   ;;  %v772_v1 = vmov 0.0   ;;  %v237_v2 = vld [vmem:[#allocation5] sm:$0xff] }
  0x5b   : > { %518 = vmatprep.subr.bf16.mxu0 %v770_v0  ;;  %515 = vmatprep.mubr.msk.f32.mxu0 %vm771_vm0, %v772_v1  ;;  %v238_v3 = vld [vmem:[#allocation5 + $0x8] sm:$0xff]  ;;  %v239_v4 = vld [vmem:[#allocation5 + $0x10] sm:$0xff]  ;;  %v240_v6 = vld [vmem:[#allocation5 + $0x18] sm:$0xff]  ;;  %s463_s24 = sshll.u32 %s756_s15, 7  ;;  %s232_s9 = scalar_lea.vmem [#allocation7], %s458_s25 }
  0x5c   : > { %v519_v5 = vpack.c.bf16 %v238_v3, %v237_v2  ;;  %v522_v7 = vpack.c.bf16 %v240_v6, %v239_v4  ;;  %v241_v8 = vld [vmem:[#allocation5 + $0x20] sm:$0xff]  ;;  %v242_v9 = vld [vmem:[#allocation5 + $0x28] sm:$0xff]  ;;  %v243_v11 = vld [vmem:[#allocation5 + $0x30] sm:$0xff]  ;;  %s346_s10 = sshll.u32 %s232_s9, 4  ;;  %s969_s29 = scalar_lea.hbm %s1021_s3, %s463_s24  ;;  %s971_s10 = int_to_ptr.vmem [resolvable:$true] %s346_s10 }
  0x5d   : > { %v525_v10 = vpack.c.bf16 %v242_v9, %v241_v8  ;;  %v244_v12 = vld [vmem:[#allocation5 + $0x38] sm:$0xff]  ;;  %v245_v14 = vld [vmem:[#allocation5 + $0x40] sm:$0xff]  ;;  %v246_v15 = vld [vmem:[#allocation5 + $0x48] sm:$0xff]  ;;  %s332_s6 = scalar_lea.sflag [#allocation4], %s943_s19  ;;  %s678_s26 = scalar_lea.vmem %s971_s10, 128 }
  0x5e   : > { %520 = vmatpush3.bf16.msra.mxu0 %v519_v5  ;;  %v528_v13 = vpack.c.bf16 %v244_v12, %v243_v11  ;;  %v531_v16 = vpack.c.bf16 %v246_v15, %v245_v14  ;;  %v247_v17 = vld [vmem:[#allocation5 + $0x50] sm:$0xff]  ;;  %v248_v18 = vld [vmem:[#allocation5 + $0x58] sm:$0xff]  ;;  %v249_v20 = vld [vmem:[#allocation5 + $0x60] sm:$0xff]  ;;  %p679_p4 = scmp.ne.s32.totalorder %s971_s10, %s678_s26  ;;  %s773_s15 = smov [#allocation7]  }
  0x5f   : > { %521 = vmatprep.subr.bf16.mxu0 %v770_v0  ;;  %v534_v19 = vpack.c.bf16 %v248_v18, %v247_v17  ;;  %v250_v21 = vld [vmem:[#allocation5 + $0x68] sm:$0xff]  ;;  %v251_v23 = vld [vmem:[#allocation5 + $0x70] sm:$0xff]  ;;  %v252_v24 = vld [vmem:[#allocation5 + $0x78] sm:$0xff]  ;;  %s682_s7 = sshll.u32 %s773_s15, 4  ;;  %s683_s7 = int_to_ptr.vmem [resolvable:$false] %s682_s7 }
  0x60   : > { %v537_v22 = vpack.c.bf16 %v250_v21, %v249_v20  ;;  %v540_v25 = vpack.c.bf16 %v252_v24, %v251_v23  ;;  %v236_v26 = vld [vmem:[%s949_s4] sm:$0xff]  ;;  %p680_p6 = pnand %p679_p4, %p890_p10  ;;  %s684_s8 = scalar_lea.vmem %s683_s7, 256 }
  0x61   : > { %v461_v27 = vld [vmem:[%s1020_s2] ss:$0 sm:$0xff]  ;;  %p685_p12 = scmp.lt.s32.totalorder %s971_s10, %s683_s7  ;;  %p686_p11 = scmp.lt.s32.totalorder %s684_s8, %s678_s26 }
  0x62   : > { %523 = vmatpush3.bf16.msra.mxu0 %v522_v7  ;;  %p681_p8 = pneg %p680_p6 }
  0x63   : > { %524 = vmatprep.subr.bf16.mxu0 %v770_v0  ;;  %p687_p0 = por %p686_p11, %p685_p12 }
  0x65   : > { %p688_p5 = pnand %p687_p0, %p681_p8 }
  0x66   : > { %526 = vmatpush3.bf16.msra.mxu0 %v525_v10 }
  0x67   : > { %527 = vmatprep.subr.bf16.mxu0 %v770_v0 }
  0x6a   : > { %529 = vmatpush3.bf16.msra.mxu0 %v528_v13 }
  0x6b   : > { %530 = vmatprep.subr.bf16.mxu0 %v770_v0 }
  0x6e   : > { %532 = vmatpush3.bf16.msra.mxu0 %v531_v16 }
  0x6f   : > { %533 = vmatprep.subr.bf16.mxu0 %v770_v0 }
  0x72   : > { %535 = vmatpush3.bf16.msra.mxu0 %v534_v19 }
  0x73   : > { %536 = vmatprep.subr.bf16.mxu0 %v770_v0 }
  0x76   : > { %538 = vmatpush3.bf16.msra.mxu0 %v537_v22 }
  0x77   : > { %539 = vmatprep.subr.bf16.mxu0 %v770_v0 }
  0x7a   : > { %541 = vmatpush3.bf16.msra.mxu0 %v540_v25 }
  0x7d   : > { %516 = vmatmul.mubr.f32.vlgmr.msra.gmra.mrb[0].mxu0 %v236_v26 }
 0x150   : > { %v326_v28 = vpop.f32.mrb[0].mxu0 }
 0x151   : > { %v327_v29 = vadd.f32 %v461_v27, %v326_v28  ;;  %v517_v30 = vpop.f32.mrb[1].mxu0 }
 0x153   : > { %330 = vst [vmem:[%s232_s9] sm:$0xff] %v327_v29 }
 0x154   : > { %691 = shalt.err (!%p688_p5)
}
 0x155   : > { %s692_s21 = scalar_lea.hbm %s969_s29, 128  ;;  %s696_s27 = scalar_lea.hbm %s1021_s3, 256 }
 0x156   : > { %p693_p9 = scmp.ne.s32.totalorder %s969_s29, %s692_s21  ;;  %p697_p7 = scmp.lt.u32.totalorder %s969_s29, %s1021_s3 }
 0x157   : > { %p698_p3 = scmp.lt.u32.totalorder %s696_s27, %s692_s21  ;;  %p700_p4 = scmp.lt.u32.totalorder %s692_s21, %s969_s29 }
 0x158   : > { %p694_p1 = pnand %p693_p9, %p890_p10 }
 0x159   : > { %p699_p13 = por %p698_p3, %p697_p7 }
 0x15a   : > { %p695_p2 = pneg %p694_p1 }
 0x15b   : > { %p701_p6 = por %p700_p4, %p699_p13 }
 0x15d   : > { %p702_p8 = pnand %p701_p6, %p695_p2 }
 0x15f   : > { %705 = shalt.err (!%p702_p8)
}
 0x160   : > { %548 = dma.vmem_to_hbm [thread:$0]  (%p890_p10), %s971_s10, 128, %s969_s29, %s332_s6  }
 0x161 PF: > { %s358_s22 = sand.u32 1, %s744_s12   ;;  %p1039_p12 = scmp.ne.s32.totalorder %s1029_s23, 0 }
 0x162   : > { %p1040_p11 = scmp.ge.s32.totalorder %s764_s17, 2  ;;  %s359_s24 = scalar_lea.sflag [#allocation4], %s358_s22 }
 0x164   : > { %p559_p0 = pnand %p1040_p11, %p1039_p12 }
 0x166   : > { %739 = dma.done.wait (!%p559_p0), %s359_s24, 128  }
 0x167   : > { %741 = vsyncadd (!%p559_p0), %s359_s24, 4294967168  ;;  %s20_s17 = sadd.s32 1, %s764_s17   ;;  %s1041_s12 = smov %s748_s13 }
 0x168   : > { %p17_p5 = scmp.ge.s32.totalorder %s20_s17, 4   ;;  %s1042_s13 = smov %s752_s14 }
 0x169   : > { %s1043_s14 = smov %s899_s5  ;;  %s1044_s15 = smov %s760_s16 }
 0x16a   : > { %s1045_s16 = smov %s1047_s28  ;;  %19 = sbr.rel (!%p17_p5) target bundleno = 7 (0x7), region = 85 }
 0x171   :  { %364 = vsyncpa [#allocation3], 1 }
 0x172   :  { %366 = vsyncpa [#allocation3 + $0x1], 1 }
 0x173   :  { %367 = vsyncpa [#allocation6], 1 }
 0x174   :  { %368 = vsyncpa [#allocation4], 1 }
 0x175   :  { %370 = vsyncpa [#allocation4 + $0x1], 1 }

</bundles_post_ra>
